<compile_context>
chip_gen: v7x
topology: tpu7x:2x2x1
jax: 0.10.0
libtpu: 0.0.40
codegen_flags: <defaults>
</compile_context>

<pallas_src>
import functools

import jax
import jax.numpy as jnp
from jax import lax
from jax.experimental import pallas as pl
from jax.experimental.pallas import tpu as pltpu

LN_EPS = 1e-5
LANE = 128
SUBLANE = 8


def _round_up(n, m):
    return ((n + m - 1) // m) * m


def _decoder_kernel(x_ref,
                    we_w_ref, w1a_ref, w2a_ref, w1b_ref, w2b_ref, wmu_ref,
                    embvec_ref, hidvec_ref, bmu_ref,
                    out_ref, *, embed_dim):
    # Bias / LayerNorm vectors live in two small VMEM-resident f32 slabs.
    we_b = embvec_ref[0:1, :]
    b2a = embvec_ref[1:2, :]
    ga = embvec_ref[2:3, :]
    ba = embvec_ref[3:4, :]
    b2b = embvec_ref[4:5, :]
    gb = embvec_ref[5:6, :]
    bb = embvec_ref[6:7, :]
    b1a = hidvec_ref[0:1, :]
    b1b = hidvec_ref[1:2, :]

    # X = self.We(X)  -- bf16 MXU operands, f32 accumulation.  K = inp_dim (=32) is fine.
    x = x_ref[...].astype(jnp.bfloat16)                       # (TB, inp_dim)
    h = jnp.dot(x, we_w_ref[...], preferred_element_type=jnp.float32) + we_b

    emb_p = h.shape[-1]
    # Lane-validity mask: LayerNorm statistics are over the true embed_dim only.
    col = lax.broadcasted_iota(jnp.int32, (1, emb_p), 1)
    valid = (col < embed_dim).astype(jnp.float32)
    inv_d = jnp.float32(1.0 / embed_dim)

    def mlp_block(h, w1, b1, w2, b2, gamma, beta):
        # Linear -> ReLU -> Linear (dropout = identity in eval mode)
        o = jnp.dot(h.astype(jnp.bfloat16), w1, preferred_element_type=jnp.float32) + b1
        o = jnp.maximum(o, 0.0)
        o = jnp.dot(o.astype(jnp.bfloat16), w2, preferred_element_type=jnp.float32) + b2
        s = o + h                                             # residual
        # LayerNorm over true embed_dim (masked mean & variance; padded lanes ignored).
        mean = jnp.sum(valid * s, axis=-1, keepdims=True) * inv_d
        c = s - mean
        var = jnp.sum(valid * (c * c), axis=-1, keepdims=True) * inv_d   # biased var
        xhat = c * lax.rsqrt(var + LN_EPS)
        # gamma/beta are zero in padded lanes -> padded lanes return to 0.
        return xhat * gamma + beta

    h = mlp_block(h, w1a_ref[...], b1a, w2a_ref[...], b2a, ga, ba)
    h = mlp_block(h, w1b_ref[...], b1b, w2b_ref[...], b2b, gb, bb)

    # mu = self.W_mu(out); return softplus(mu)  (output is lane-tight: N == outp_dim,
    # so the exp/log1p transcendentals only run over real columns).
    mu = jnp.dot(h.astype(jnp.bfloat16), wmu_ref[...],
                 preferred_element_type=jnp.float32) + bmu_ref[...]
    out_ref[...] = jnp.maximum(mu, 0.0) + jnp.log1p(jnp.exp(-jnp.abs(mu)))


def mlp_decoder(x, params, *, block_batch=2048):
    """x: (batch, inp_dim) float32. params: dict of [in, out] weights / (1, N) biases."""
    batch, inp_dim = x.shape
    embed_dim = params["we_w"].shape[1]
    hid_dim = params["w1a"].shape[1]
    outp_dim = params["wmu"].shape[1]

    emb_p = _round_up(embed_dim, LANE)
    hid_p = _round_up(hid_dim, LANE)

    def pad2(a, rows, cols):
        return jnp.pad(a, ((0, rows - a.shape[0]), (0, cols - a.shape[1])))

    # Weight matrices (stored [in, out]); zero-pad only internal embed/hid dims,
    # keep K = inp_dim and N = outp_dim at their true sizes.  bf16 MXU operands.
    we_w = pad2(params["we_w"], inp_dim, emb_p).astype(jnp.bfloat16)
    w1a = pad2(params["w1a"], emb_p, hid_p).astype(jnp.bfloat16)
    w2a = pad2(params["w2a"], hid_p, emb_p).astype(jnp.bfloat16)
    w1b = pad2(params["w1b"], emb_p, hid_p).astype(jnp.bfloat16)
    w2b = pad2(params["w2b"], hid_p, emb_p).astype(jnp.bfloat16)
    wmu = pad2(params["wmu"], emb_p, outp_dim).astype(jnp.bfloat16)

    # Stack the small bias / LayerNorm vectors into two resident f32 slabs.
    embvec = jnp.zeros((SUBLANE, emb_p), jnp.float32)
    for r, name in enumerate(("we_b", "b2a", "ga", "ba", "b2b", "gb", "bb")):
        embvec = embvec.at[r, :params[name].shape[1]].set(params[name][0])
    hidvec = jnp.zeros((SUBLANE, hid_p), jnp.float32)
    for r, name in enumerate(("b1a", "b1b")):
        hidvec = hidvec.at[r, :params[name].shape[1]].set(params[name][0])
    bmu = params["bmu"].astype(jnp.float32)               # (1, outp_dim)

    # Adaptive batch tile: minimal row padding, >= 2 grid steps when the batch
    # allows it (v7x has 2 TensorCores; harmless on v5e/v6e).
    n_tiles = pl.cdiv(batch, block_batch)
    if batch >= 2 * SUBLANE:
        n_tiles = max(n_tiles, 2)
    tb = _round_up(pl.cdiv(batch, n_tiles), SUBLANE)
    batch_p = _round_up(batch, tb)
    grid = (batch_p // tb,)
    xp = x if batch_p == batch else jnp.pad(x, ((0, batch_p - batch), (0, 0)))

    weight_args = (we_w, w1a, w2a, w1b, w2b, wmu, embvec, hidvec, bmu)

    in_specs = [pl.BlockSpec((tb, inp_dim), lambda i: (i, 0))]            # streamed tiles
    in_specs += [pl.BlockSpec(w.shape, lambda i: (0, 0)) for w in weight_args]  # resident
    out_specs = pl.BlockSpec((tb, outp_dim), lambda i: (i, 0))

    # VMEM budget: resident params + double-buffered x/out tiles + f32 intermediates,
    # capped at ~3/4 of this generation's physical VMEM (v7x: 64 MiB/TC).
    param_bytes = sum(int(w.size) * w.dtype.itemsize for w in weight_args)
    tile_bytes = 2 * 2 * tb * (inp_dim + outp_dim) * 4
    interm_bytes = 10 * tb * max(emb_p, hid_p) * 4
    want = param_bytes + tile_bytes + interm_bytes + (4 << 20)
    try:
        vmem_cap = int(pltpu.get_tpu_info().vmem_capacity_bytes)
    except Exception:
        vmem_cap = 64 << 20
    vmem_limit = min((vmem_cap * 3) // 4, max(16 << 20, want))

    out = pl.pallas_call(
        functools.partial(_decoder_kernel, embed_dim=embed_dim),
        out_shape=jax.ShapeDtypeStruct((batch_p, outp_dim), jnp.float32),
        grid=grid,
        in_specs=in_specs,
        out_specs=out_specs,
        compiler_params=pltpu.CompilerParams(
            dimension_semantics=("parallel",),
            vmem_limit_bytes=int(vmem_limit)),
    )(xp, *weight_args)

    return out if batch_p == batch else out[:batch]


def init_params(key, inp_dim, embed_dim, outp_dim, mlp_embed_factor=2):
    """Deterministic synthetic parameters (weights stored as [in, out])."""
    hid = embed_dim * mlp_embed_factor
    keys = jax.random.split(key, 16)
    k = iter(keys)

    def lin(kk, fan_in, fan_out):
        scale = 1.0 / jnp.sqrt(fan_in)
        return jax.random.uniform(kk, (fan_in, fan_out), jnp.float32, -scale, scale)

    p = {}
    p["we_w"] = lin(next(k), inp_dim, embed_dim)
    p["we_b"] = jax.random.uniform(next(k), (1, embed_dim), jnp.float32, -0.1, 0.1)

    # MLPBlock A
    p["w1a"] = lin(next(k), embed_dim, hid)
    p["b1a"] = jax.random.uniform(next(k), (1, hid), jnp.float32, -0.1, 0.1)
    p["w2a"] = lin(next(k), hid, embed_dim)
    p["b2a"] = jax.random.uniform(next(k), (1, embed_dim), jnp.float32, -0.1, 0.1)
    p["ga"] = jnp.ones((1, embed_dim), jnp.float32)
    p["ba"] = jnp.zeros((1, embed_dim), jnp.float32)

    # MLPBlock B
    p["w1b"] = lin(next(k), embed_dim, hid)
    p["b1b"] = jax.random.uniform(next(k), (1, hid), jnp.float32, -0.1, 0.1)
    p["w2b"] = lin(next(k), hid, embed_dim)
    p["b2b"] = jax.random.uniform(next(k), (1, embed_dim), jnp.float32, -0.1, 0.1)
    p["gb"] = jnp.ones((1, embed_dim), jnp.float32)
    p["bb"] = jnp.zeros((1, embed_dim), jnp.float32)

    p["wmu"] = lin(next(k), embed_dim, outp_dim)
    p["bmu"] = jax.random.uniform(next(k), (1, outp_dim), jnp.float32, -0.1, 0.1)
    return p


def reference_forward(x, p):
    """Pure-JAX f32 reference mirroring the PyTorch MLPDecoder forward (eval mode)."""
    hi = lax.Precision.HIGHEST

    h = jnp.dot(x, p["we_w"], precision=hi) + p["we_b"]

    def block(h, w1, b1, w2, b2, g, b):
        o = jnp.maximum(jnp.dot(h, w1, precision=hi) + b1, 0.0)
        o = jnp.dot(o, w2, precision=hi) + b2
        s = o + h
        mean = jnp.mean(s, axis=-1, keepdims=True)
        var = jnp.mean((s - mean) ** 2, axis=-1, keepdims=True)
        return ((s - mean) / jnp.sqrt(var + LN_EPS)) * g + b

    h = block(h, p["w1a"], p["b1a"], p["w2a"], p["b2a"], p["ga"], p["ba"])
    h = block(h, p["w1b"], p["b1b"], p["w2b"], p["b2b"], p["gb"], p["bb"])
    mu = jnp.dot(h, p["wmu"], precision=hi) + p["bmu"]
    return jax.nn.softplus(mu)


if __name__ == "__main__":
    inp_dim, embed_dim, outp_dim = 32, 32, 16
    key = jax.random.PRNGKey(0)
    kx, kp, kx2 = jax.random.split(key, 3)
    params = init_params(kp, inp_dim, embed_dim, outp_dim)

    # bf16 MXU operands with f32 accumulation -> tolerance loosened vs f32 reference.
    TOL = 3e-2

    # Small single-tile case.
    batch = 8
    x = jax.random.normal(kx, (batch, inp_dim), jnp.float32)
    out = jax.block_until_ready(mlp_decoder(x, params))
    ref = reference_forward(x, params)
    assert out.shape == (batch, outp_dim)
    assert jnp.allclose(out, ref, atol=TOL, rtol=TOL), (
        f"max abs err = {jnp.max(jnp.abs(out - ref))}")

    # Multi-tile case (exercises grid >= 2 and batch-row padding).
    batch2 = 300
    x2 = jax.random.normal(kx2, (batch2, inp_dim), jnp.float32)
    out2 = jax.block_until_ready(mlp_decoder(x2, params))
    ref2 = reference_forward(x2, params)
    assert out2.shape == (batch2, outp_dim)
    assert jnp.allclose(out2, ref2, atol=TOL, rtol=TOL), (
        f"max abs err = {jnp.max(jnp.abs(out2 - ref2))}")

    print("KERNEL_OK")
</pallas_src>

<mosaic_0001>
module attributes {stable_mosaic.version = 11 : i64} {
  func.func @_decoder_kernel(%arg0: i32, %arg1: memref<8x32xf32, #tpu.memory_space<vmem>>, %arg2: memref<32x128xbf16, #tpu.memory_space<vmem>>, %arg3: memref<128x128xbf16, #tpu.memory_space<vmem>>, %arg4: memref<128x128xbf16, #tpu.memory_space<vmem>>, %arg5: memref<128x128xbf16, #tpu.memory_space<vmem>>, %arg6: memref<128x128xbf16, #tpu.memory_space<vmem>>, %arg7: memref<128x16xbf16, #tpu.memory_space<vmem>>, %arg8: memref<8x128xf32, #tpu.memory_space<vmem>>, %arg9: memref<8x128xf32, #tpu.memory_space<vmem>>, %arg10: memref<1x16xf32, #tpu.memory_space<vmem>>, %arg11: memref<8x16xf32, #tpu.memory_space<vmem>>) attributes {dimension_semantics = [#tpu.dimension_semantics<parallel>], iteration_bounds = array<i64: 1>, scalar_prefetch = 0 : i64, scratch_operands = 0 : i64, tpu.core_type = #tpu.core_type<tc>, window_params = [{transform_indices = @transform_0, window_bounds = array<i64: 8, 32>}, {pipeline_mode = #tpu.pipeline_mode<synchronous>, transform_indices = @transform_1, window_bounds = array<i64: 32, 128>}, {pipeline_mode = #tpu.pipeline_mode<synchronous>, transform_indices = @transform_2, window_bounds = array<i64: 128, 128>}, {pipeline_mode = #tpu.pipeline_mode<synchronous>, transform_indices = @transform_3, window_bounds = array<i64: 128, 128>}, {pipeline_mode = #tpu.pipeline_mode<synchronous>, transform_indices = @transform_4, window_bounds = array<i64: 128, 128>}, {pipeline_mode = #tpu.pipeline_mode<synchronous>, transform_indices = @transform_5, window_bounds = array<i64: 128, 128>}, {pipeline_mode = #tpu.pipeline_mode<synchronous>, transform_indices = @transform_6, window_bounds = array<i64: 128, 16>}, {pipeline_mode = #tpu.pipeline_mode<synchronous>, transform_indices = @transform_7, window_bounds = array<i64: 8, 128>}, {pipeline_mode = #tpu.pipeline_mode<synchronous>, transform_indices = @transform_8, window_bounds = array<i64: 8, 128>}, {pipeline_mode = #tpu.pipeline_mode<synchronous>, transform_indices = @transform_9, window_bounds = array<i64: 1, 16>}, {transform_indices = @transform_10, window_bounds = array<i64: 8, 16>}]} {
    %c0 = arith.constant 0 : index
    %c0_0 = arith.constant 0 : index
    %0 = vector.load %arg8[%c0, %c0_0] : memref<8x128xf32, #tpu.memory_space<vmem>>, vector<1x128xf32>
    %c1 = arith.constant 1 : index
    %c0_1 = arith.constant 0 : index
    %1 = vector.load %arg8[%c1, %c0_1] : memref<8x128xf32, #tpu.memory_space<vmem>>, vector<1x128xf32>
    %c2 = arith.constant 2 : index
    %c0_2 = arith.constant 0 : index
    %2 = vector.load %arg8[%c2, %c0_2] : memref<8x128xf32, #tpu.memory_space<vmem>>, vector<1x128xf32>
    %c3 = arith.constant 3 : index
    %c0_3 = arith.constant 0 : index
    %3 = vector.load %arg8[%c3, %c0_3] : memref<8x128xf32, #tpu.memory_space<vmem>>, vector<1x128xf32>
    %c4 = arith.constant 4 : index
    %c0_4 = arith.constant 0 : index
    %4 = vector.load %arg8[%c4, %c0_4] : memref<8x128xf32, #tpu.memory_space<vmem>>, vector<1x128xf32>
    %c5 = arith.constant 5 : index
    %c0_5 = arith.constant 0 : index
    %5 = vector.load %arg8[%c5, %c0_5] : memref<8x128xf32, #tpu.memory_space<vmem>>, vector<1x128xf32>
    %c6 = arith.constant 6 : index
    %c0_6 = arith.constant 0 : index
    %6 = vector.load %arg8[%c6, %c0_6] : memref<8x128xf32, #tpu.memory_space<vmem>>, vector<1x128xf32>
    %c0_7 = arith.constant 0 : index
    %c0_8 = arith.constant 0 : index
    %7 = vector.load %arg9[%c0_7, %c0_8] : memref<8x128xf32, #tpu.memory_space<vmem>>, vector<1x128xf32>
    %c1_9 = arith.constant 1 : index
    %c0_10 = arith.constant 0 : index
    %8 = vector.load %arg9[%c1_9, %c0_10] : memref<8x128xf32, #tpu.memory_space<vmem>>, vector<1x128xf32>
    %c0_11 = arith.constant 0 : index
    %c0_12 = arith.constant 0 : index
    %9 = vector.load %arg1[%c0_11, %c0_12] : memref<8x32xf32, #tpu.memory_space<vmem>>, vector<8x32xf32>
    %10 = arith.truncf %9 : vector<8x32xf32> to vector<8x32xbf16>
    %c0_13 = arith.constant 0 : index
    %c0_14 = arith.constant 0 : index
    %11 = vector.load %arg2[%c0_13, %c0_14] : memref<32x128xbf16, #tpu.memory_space<vmem>>, vector<32x128xbf16>
    %cst = arith.constant dense<0.000000e+00> : vector<8x128xf32>
    %12 = tpu.matmul %10, %11, %cst {dimension_numbers = #tpu.dot_dimension_numbers<[1], [0], [0], [1], [0, 0, 1, 1], [], []>} : vector<8x32xbf16>, vector<32x128xbf16>, vector<8x128xf32> -> vector<8x128xf32>
    %13 = vector.broadcast %0 : vector<1x128xf32> to vector<8x128xf32>
    %14 = arith.addf %12, %13 : vector<8x128xf32>
    %15 = tpu.iota {dimensions = array<i32: 1>} : vector<1x128xi32>
    %c32_i32 = arith.constant 32 : i32
    %16 = vector.broadcast %c32_i32 : i32 to vector<1x128xi32>
    %17 = arith.cmpi slt, %15, %16 : vector<1x128xi32>
    %18 = arith.extui %17 : vector<1x128xi1> to vector<1x128xi32>
    %19 = arith.sitofp %18 : vector<1x128xi32> to vector<1x128xf32>
    %c0_15 = arith.constant 0 : index
    %c0_16 = arith.constant 0 : index
    %20 = vector.load %arg3[%c0_15, %c0_16] : memref<128x128xbf16, #tpu.memory_space<vmem>>, vector<128x128xbf16>
    %c0_17 = arith.constant 0 : index
    %c0_18 = arith.constant 0 : index
    %21 = vector.load %arg4[%c0_17, %c0_18] : memref<128x128xbf16, #tpu.memory_space<vmem>>, vector<128x128xbf16>
    %22 = arith.truncf %14 : vector<8x128xf32> to vector<8x128xbf16>
    %cst_19 = arith.constant dense<0.000000e+00> : vector<8x128xf32>
    %23 = tpu.matmul %22, %20, %cst_19 {dimension_numbers = #tpu.dot_dimension_numbers<[1], [0], [0], [1], [0, 0, 1, 1], [], []>} : vector<8x128xbf16>, vector<128x128xbf16>, vector<8x128xf32> -> vector<8x128xf32>
    %24 = vector.broadcast %7 : vector<1x128xf32> to vector<8x128xf32>
    %25 = arith.addf %23, %24 : vector<8x128xf32>
    %cst_20 = arith.constant 0.000000e+00 : f32
    %26 = vector.broadcast %cst_20 : f32 to vector<8x128xf32>
    %27 = arith.maximumf %25, %26 : vector<8x128xf32>
    %28 = arith.truncf %27 : vector<8x128xf32> to vector<8x128xbf16>
    %cst_21 = arith.constant dense<0.000000e+00> : vector<8x128xf32>
    %29 = tpu.matmul %28, %21, %cst_21 {dimension_numbers = #tpu.dot_dimension_numbers<[1], [0], [0], [1], [0, 0, 1, 1], [], []>} : vector<8x128xbf16>, vector<128x128xbf16>, vector<8x128xf32> -> vector<8x128xf32>
    %30 = vector.broadcast %1 : vector<1x128xf32> to vector<8x128xf32>
    %31 = arith.addf %29, %30 : vector<8x128xf32>
    %32 = arith.addf %31, %14 : vector<8x128xf32>
    %33 = vector.broadcast %19 : vector<1x128xf32> to vector<8x128xf32>
    %34 = arith.mulf %33, %32 : vector<8x128xf32>
    %cst_22 = arith.constant dense<0.000000e+00> : vector<8xf32>
    %35 = vector.multi_reduction <add>, %34, %cst_22 [1] : vector<8x128xf32> to vector<8xf32>
    %36 = vector.shape_cast %35 : vector<8xf32> to vector<8x1xf32>
    %cst_23 = arith.constant 3.125000e-02 : f32
    %37 = vector.broadcast %cst_23 : f32 to vector<8x1xf32>
    %38 = arith.mulf %36, %37 : vector<8x1xf32>
    %39 = vector.broadcast %38 : vector<8x1xf32> to vector<8x128xf32>
    %40 = arith.subf %32, %39 : vector<8x128xf32>
    %41 = arith.mulf %40, %40 : vector<8x128xf32>
    %42 = vector.broadcast %19 : vector<1x128xf32> to vector<8x128xf32>
    %43 = arith.mulf %42, %41 : vector<8x128xf32>
    %cst_24 = arith.constant dense<0.000000e+00> : vector<8xf32>
    %44 = vector.multi_reduction <add>, %43, %cst_24 [1] : vector<8x128xf32> to vector<8xf32>
    %45 = vector.shape_cast %44 : vector<8xf32> to vector<8x1xf32>
    %cst_25 = arith.constant 3.125000e-02 : f32
    %46 = vector.broadcast %cst_25 : f32 to vector<8x1xf32>
    %47 = arith.mulf %45, %46 : vector<8x1xf32>
    %cst_26 = arith.constant 9.99999974E-6 : f32
    %48 = vector.broadcast %cst_26 : f32 to vector<8x1xf32>
    %49 = arith.addf %47, %48 : vector<8x1xf32>
    %50 = math.rsqrt %49 : vector<8x1xf32>
    %51 = vector.broadcast %50 : vector<8x1xf32> to vector<8x128xf32>
    %52 = arith.mulf %40, %51 : vector<8x128xf32>
    %53 = vector.broadcast %2 : vector<1x128xf32> to vector<8x128xf32>
    %54 = arith.mulf %52, %53 : vector<8x128xf32>
    %55 = vector.broadcast %3 : vector<1x128xf32> to vector<8x128xf32>
    %56 = arith.addf %54, %55 : vector<8x128xf32>
    %c0_27 = arith.constant 0 : index
    %c0_28 = arith.constant 0 : index
    %57 = vector.load %arg5[%c0_27, %c0_28] : memref<128x128xbf16, #tpu.memory_space<vmem>>, vector<128x128xbf16>
    %c0_29 = arith.constant 0 : index
    %c0_30 = arith.constant 0 : index
    %58 = vector.load %arg6[%c0_29, %c0_30] : memref<128x128xbf16, #tpu.memory_space<vmem>>, vector<128x128xbf16>
    %59 = arith.truncf %56 : vector<8x128xf32> to vector<8x128xbf16>
    %cst_31 = arith.constant dense<0.000000e+00> : vector<8x128xf32>
    %60 = tpu.matmul %59, %57, %cst_31 {dimension_numbers = #tpu.dot_dimension_numbers<[1], [0], [0], [1], [0, 0, 1, 1], [], []>} : vector<8x128xbf16>, vector<128x128xbf16>, vector<8x128xf32> -> vector<8x128xf32>
    %61 = vector.broadcast %8 : vector<1x128xf32> to vector<8x128xf32>
    %62 = arith.addf %60, %61 : vector<8x128xf32>
    %cst_32 = arith.constant 0.000000e+00 : f32
    %63 = vector.broadcast %cst_32 : f32 to vector<8x128xf32>
    %64 = arith.maximumf %62, %63 : vector<8x128xf32>
    %65 = arith.truncf %64 : vector<8x128xf32> to vector<8x128xbf16>
    %cst_33 = arith.constant dense<0.000000e+00> : vector<8x128xf32>
    %66 = tpu.matmul %65, %58, %cst_33 {dimension_numbers = #tpu.dot_dimension_numbers<[1], [0], [0], [1], [0, 0, 1, 1], [], []>} : vector<8x128xbf16>, vector<128x128xbf16>, vector<8x128xf32> -> vector<8x128xf32>
    %67 = vector.broadcast %4 : vector<1x128xf32> to vector<8x128xf32>
    %68 = arith.addf %66, %67 : vector<8x128xf32>
    %69 = arith.addf %68, %56 : vector<8x128xf32>
    %70 = vector.broadcast %19 : vector<1x128xf32> to vector<8x128xf32>
    %71 = arith.mulf %70, %69 : vector<8x128xf32>
    %cst_34 = arith.constant dense<0.000000e+00> : vector<8xf32>
    %72 = vector.multi_reduction <add>, %71, %cst_34 [1] : vector<8x128xf32> to vector<8xf32>
    %73 = vector.shape_cast %72 : vector<8xf32> to vector<8x1xf32>
    %cst_35 = arith.constant 3.125000e-02 : f32
    %74 = vector.broadcast %cst_35 : f32 to vector<8x1xf32>
    %75 = arith.mulf %73, %74 : vector<8x1xf32>
    %76 = vector.broadcast %75 : vector<8x1xf32> to vector<8x128xf32>
    %77 = arith.subf %69, %76 : vector<8x128xf32>
    %78 = arith.mulf %77, %77 : vector<8x128xf32>
    %79 = vector.broadcast %19 : vector<1x128xf32> to vector<8x128xf32>
    %80 = arith.mulf %79, %78 : vector<8x128xf32>
    %cst_36 = arith.constant dense<0.000000e+00> : vector<8xf32>
    %81 = vector.multi_reduction <add>, %80, %cst_36 [1] : vector<8x128xf32> to vector<8xf32>
    %82 = vector.shape_cast %81 : vector<8xf32> to vector<8x1xf32>
    %cst_37 = arith.constant 3.125000e-02 : f32
    %83 = vector.broadcast %cst_37 : f32 to vector<8x1xf32>
    %84 = arith.mulf %82, %83 : vector<8x1xf32>
    %cst_38 = arith.constant 9.99999974E-6 : f32
    %85 = vector.broadcast %cst_38 : f32 to vector<8x1xf32>
    %86 = arith.addf %84, %85 : vector<8x1xf32>
    %87 = math.rsqrt %86 : vector<8x1xf32>
    %88 = vector.broadcast %87 : vector<8x1xf32> to vector<8x128xf32>
    %89 = arith.mulf %77, %88 : vector<8x128xf32>
    %90 = vector.broadcast %5 : vector<1x128xf32> to vector<8x128xf32>
    %91 = arith.mulf %89, %90 : vector<8x128xf32>
    %92 = vector.broadcast %6 : vector<1x128xf32> to vector<8x128xf32>
    %93 = arith.addf %91, %92 : vector<8x128xf32>
    %94 = arith.truncf %93 : vector<8x128xf32> to vector<8x128xbf16>
    %c0_39 = arith.constant 0 : index
    %c0_40 = arith.constant 0 : index
    %95 = vector.load %arg7[%c0_39, %c0_40] : memref<128x16xbf16, #tpu.memory_space<vmem>>, vector<128x16xbf16>
    %cst_41 = arith.constant dense<0.000000e+00> : vector<8x16xf32>
    %96 = tpu.matmul %94, %95, %cst_41 {dimension_numbers = #tpu.dot_dimension_numbers<[1], [0], [0], [1], [0, 0, 1, 1], [], []>} : vector<8x128xbf16>, vector<128x16xbf16>, vector<8x16xf32> -> vector<8x16xf32>
    %c0_42 = arith.constant 0 : index
    %c0_43 = arith.constant 0 : index
    %97 = vector.load %arg10[%c0_42, %c0_43] : memref<1x16xf32, #tpu.memory_space<vmem>>, vector<1x16xf32>
    %98 = vector.broadcast %97 : vector<1x16xf32> to vector<8x16xf32>
    %99 = arith.addf %96, %98 : vector<8x16xf32>
    %cst_44 = arith.constant 0.000000e+00 : f32
    %100 = vector.broadcast %cst_44 : f32 to vector<8x16xf32>
    %101 = arith.maximumf %99, %100 : vector<8x16xf32>
    %102 = math.absf %99 : vector<8x16xf32>
    %cst_45 = arith.constant 0.000000e+00 : f32
    %103 = vector.broadcast %cst_45 : f32 to vector<8x16xf32>
    %104 = arith.subf %103, %102 : vector<8x16xf32>
    %105 = math.exp %104 : vector<8x16xf32>
    %106 = math.log1p %105 : vector<8x16xf32>
    %107 = arith.addf %101, %106 : vector<8x16xf32>
    %c0_46 = arith.constant 0 : index
    %c0_47 = arith.constant 0 : index
    %108 = vector.load %arg11[%c0_46, %c0_47] : memref<8x16xf32, #tpu.memory_space<vmem>>, vector<8x16xf32>
    tpu.vector_store %arg11[%c0_46, %c0_47], %107 {strides = array<i32>} : memref<8x16xf32, #tpu.memory_space<vmem>>, vector<8x16xf32>,
    return
  }
  func.func @transform_0(%arg0: i32) -> (i32, i32) {
    %c0_i32 = arith.constant 0 : i32
    %c0_i32_0 = arith.constant 0 : i32
    return %arg0, %c0_i32 : i32, i32
  }
  func.func @transform_1(%arg0: i32) -> (i32, i32) {
    %c0_i32 = arith.constant 0 : i32
    %c0_i32_0 = arith.constant 0 : i32
    %c0_i32_1 = arith.constant 0 : i32
    return %c0_i32, %c0_i32_0 : i32, i32
  }
  func.func @transform_2(%arg0: i32) -> (i32, i32) {
    %c0_i32 = arith.constant 0 : i32
    %c0_i32_0 = arith.constant 0 : i32
    %c0_i32_1 = arith.constant 0 : i32
    return %c0_i32, %c0_i32_0 : i32, i32
  }
  func.func @transform_3(%arg0: i32) -> (i32, i32) {
    %c0_i32 = arith.constant 0 : i32
    %c0_i32_0 = arith.constant 0 : i32
    %c0_i32_1 = arith.constant 0 : i32
    return %c0_i32, %c0_i32_0 : i32, i32
  }
  func.func @transform_4(%arg0: i32) -> (i32, i32) {
    %c0_i32 = arith.constant 0 : i32
    %c0_i32_0 = arith.constant 0 : i32
    %c0_i32_1 = arith.constant 0 : i32
    return %c0_i32, %c0_i32_0 : i32, i32
  }
  func.func @transform_5(%arg0: i32) -> (i32, i32) {
    %c0_i32 = arith.constant 0 : i32
    %c0_i32_0 = arith.constant 0 : i32
    %c0_i32_1 = arith.constant 0 : i32
    return %c0_i32, %c0_i32_0 : i32, i32
  }
  func.func @transform_6(%arg0: i32) -> (i32, i32) {
    %c0_i32 = arith.constant 0 : i32
    %c0_i32_0 = arith.constant 0 : i32
    %c0_i32_1 = arith.constant 0 : i32
    return %c0_i32, %c0_i32_0 : i32, i32
  }
  func.func @transform_7(%arg0: i32) -> (i32, i32) {
    %c0_i32 = arith.constant 0 : i32
    %c0_i32_0 = arith.constant 0 : i32
    %c0_i32_1 = arith.constant 0 : i32
    return %c0_i32, %c0_i32_0 : i32, i32
  }
  func.func @transform_8(%arg0: i32) -> (i32, i32) {
    %c0_i32 = arith.constant 0 : i32
    %c0_i32_0 = arith.constant 0 : i32
    %c0_i32_1 = arith.constant 0 : i32
    return %c0_i32, %c0_i32_0 : i32, i32
  }
  func.func @transform_9(%arg0: i32) -> (i32, i32) {
    %c0_i32 = arith.constant 0 : i32
    %c0_i32_0 = arith.constant 0 : i32
    %c0_i32_1 = arith.constant 0 : i32
    return %c0_i32, %c0_i32_0 : i32, i32
  }
  func.func @transform_10(%arg0: i32) -> (i32, i32) {
    %c0_i32 = arith.constant 0 : i32
    %c0_i32_0 = arith.constant 0 : i32
    return %arg0, %c0_i32 : i32, i32
  }
}

</mosaic_0001>

<bundles_post_ra>
// kernel: tpu_custom_call.1
= control target key start
LH: loop header
LB: loop body
LE: loop exit
PB: predicated region body
PF: predicated region fallthrough
CT: control target
= control target key end

     0   :  { %15 = vsyncpa [#allocation3], 0  ;;  %s1483_s0 = inlined_call_operand.vmem [shape: f32[8,32], index: 0, kind: input, shape index: {}]   ;;  %s1484_s1 = inlined_call_operand.hbm [shape: bf16[32,128], index: 1, kind: input, shape index: {}]   ;;  %s1485_s2 = inlined_call_operand.vmem [shape: bf16[128,128], index: 2, kind: input, shape index: {}]   ;;  %s1486_s3 = inlined_call_operand.hbm [shape: bf16[128,128], index: 3, kind: input, shape index: {}]   ;;  %s1487_s4 = inlined_call_operand.hbm [shape: bf16[128,128], index: 4, kind: input, shape index: {}]   ;;  %s1488_s5 = inlined_call_operand.hbm [shape: bf16[128,128], index: 5, kind: input, shape index: {}]   ;;  %s1489_s6 = inlined_call_operand.vmem [shape: bf16[128,16], index: 6, kind: input, shape index: {}]   ;;  %s1490_s7 = inlined_call_operand.vmem [shape: f32[8,128], index: 7, kind: input, shape index: {}]   ;;  %s1491_s8 = inlined_call_operand.vmem [shape: f32[8,128], index: 8, kind: input, shape index: {}]   ;;  %s1492_s9 = inlined_call_operand.vmem [shape: f32[1,16], index: 9, kind: input, shape index: {}]   ;;  %s1493_s10 = inlined_call_operand.hbm [shape: f32[8,16], index: 10, kind: output, shape index: {}]  }
   0x1   :  { %16 = vsyncpa [#allocation6], 0 }
   0x2   :  { %17 = vsyncpa [#allocation9], 0 }
   0x3   :  { %18 = vsyncpa [#allocation4], 0  ;;  %s1191_s13 = smov [#allocation5]   ;;  %s1192_s15 = smov [#allocation2]  }
   0x4   :  { %s40_s14 = sshll.u32 %s1191_s13, 4  ;;  %s26_s16 = sshll.u32 %s1192_s15, 4  ;;  %s41_s14 = int_to_ptr.vmem [resolvable:$true] %s40_s14  ;;  %s1255_s16 = int_to_ptr.vmem [resolvable:$true] %s26_s16 }
   0x5   :  { %s1073_s19 = scalar_lea.hbm %s1486_s3, 1024 }
   0x6   :  { %p1074_p0 = scmp.ne.s32.totalorder %s1486_s3, %s1073_s19  ;;  %p1077_p1 = scmp.lt.u32.totalorder %s1073_s19, %s1486_s3 }
   0x8   :  { %p1079_p2 = pnand %p1077_p1, %p1074_p0 }
   0xa   :  { %1082 = shalt.err (!%p1079_p2)
}
   0xb   :  { %s1083_s24 = scalar_lea.vmem %s41_s14, 1024  ;;  %p1088_p4 = scmp.lt.s32.totalorder %s41_s14, %s41_s14 }
   0xc   :  { %p1084_p3 = scmp.ne.s32.totalorder %s41_s14, %s1083_s24  ;;  %p1089_p5 = scmp.lt.s32.totalorder %s1083_s24, %s1083_s24 }
   0xe   :  { %p1090_p6 = por %p1089_p5, %p1088_p4 }
  0x10   :  { %p1091_p7 = pnand %p1090_p6, %p1084_p3 }
  0x12   :  { %1094 = shalt.err (!%p1091_p7)
}
  0x13   :  { %s1193_s25 = smov 64   ;;  %s1194_s26 = smov 4  }
  0x14   :  { %46 = dma.hbm_to_vmem [thread:$0]  %s1486_s3, 1024, %s41_s14, [#allocation6], %s1193_s25, %s1193_s25, %s1194_s26  }
  0x15   :  { %s1095_s11 = scalar_lea.hbm %s1484_s1, 256 }
  0x16   :  { %p1096_p8 = scmp.ne.s32.totalorder %s1484_s1, %s1095_s11  ;;  %p1099_p9 = scmp.lt.u32.totalorder %s1095_s11, %s1484_s1 }
  0x18   :  { %p1101_p10 = pnand %p1099_p9, %p1096_p8 }
  0x1a   :  { %1104 = shalt.err (!%p1101_p10)
}
  0x1b   :  { %s1105_s18 = scalar_lea.vmem %s1255_s16, 256  ;;  %p1110_p12 = scmp.lt.s32.totalorder %s1255_s16, %s1255_s16 }
  0x1c   :  { %p1106_p11 = scmp.ne.s32.totalorder %s1255_s16, %s1105_s18  ;;  %p1111_p13 = scmp.lt.s32.totalorder %s1105_s18, %s1105_s18 }
  0x1e   :  { %p1112_p0 = por %p1111_p13, %p1110_p12 }
  0x20   :  { %p1113_p1 = pnand %p1112_p0, %p1106_p11 }
  0x22   :  { %1116 = shalt.err (!%p1113_p1)
}
  0x23   :  { %32 = dma.hbm_to_vmem [thread:$0]  %s1484_s1, 256, %s1255_s16, [#allocation3], %s1193_s25, %s1193_s25, %s1194_s26  }
  0x24   :  { %s1195_s19 = smov [#allocation7]   ;;  %s1196_s21 = smov [#allocation8]  }
  0x25   :  { %s52_s20 = sshll.u32 %s1195_s19, 4  ;;  %s64_s22 = sshll.u32 %s1196_s21, 4  ;;  %s53_s20 = int_to_ptr.vmem [resolvable:$true] %s52_s20  ;;  %s1292_s22 = int_to_ptr.vmem [resolvable:$true] %s64_s22 }
  0x26   :  { %s1117_s27 = scalar_lea.hbm %s1487_s4, 1024 }
  0x27   :  { %p1118_p2 = scmp.ne.s32.totalorder %s1487_s4, %s1117_s27  ;;  %p1121_p3 = scmp.lt.u32.totalorder %s1117_s27, %s1487_s4 }
  0x29   :  { %p1123_p4 = pnand %p1121_p3, %p1118_p2 }
  0x2b   :  { %1126 = shalt.err (!%p1123_p4)
}
  0x2c   :  { %s1127_s1 = scalar_lea.vmem %s53_s20, 1024  ;;  %p1132_p6 = scmp.lt.s32.totalorder %s53_s20, %s53_s20 }
  0x2d   :  { %p1128_p5 = scmp.ne.s32.totalorder %s53_s20, %s1127_s1  ;;  %p1133_p7 = scmp.lt.s32.totalorder %s1127_s1, %s1127_s1 }
  0x2f   :  { %p1134_p8 = por %p1133_p7, %p1132_p6 }
  0x31   :  { %p1135_p9 = pnand %p1134_p8, %p1128_p5 }
  0x33   :  { %1138 = shalt.err (!%p1135_p9)
}
  0x34   :  { %58 = dma.hbm_to_vmem [thread:$0]  %s1487_s4, 1024, %s53_s20, [#allocation6], %s1193_s25, %s1193_s25, %s1194_s26  }
  0x35   :  { %s1139_s17 = scalar_lea.hbm %s1488_s5, 1024 }
  0x36   :  { %p1140_p10 = scmp.ne.s32.totalorder %s1488_s5, %s1139_s17  ;;  %p1143_p11 = scmp.lt.u32.totalorder %s1139_s17, %s1488_s5 }
  0x38   :  { %p1145_p12 = pnand %p1143_p11, %p1140_p10 }
  0x3a   :  { %1148 = shalt.err (!%p1145_p12)
}
  0x3b   :  { %s1149_s21 = scalar_lea.vmem %s1292_s22, 1024  ;;  %p1154_p0 = scmp.lt.s32.totalorder %s1292_s22, %s1292_s22 }
  0x3c   :  { %p1150_p13 = scmp.ne.s32.totalorder %s1292_s22, %s1149_s21  ;;  %p1155_p1 = scmp.lt.s32.totalorder %s1149_s21, %s1149_s21 }
  0x3e   :  { %p1156_p2 = por %p1155_p1, %p1154_p0 }
  0x40   :  { %p1157_p3 = pnand %p1156_p2, %p1150_p13 }
  0x42   :  { %1160 = shalt.err (!%p1157_p3)
}
  0x43   :  { %70 = dma.hbm_to_vmem [thread:$0]  %s1488_s5, 1024, %s1292_s22, [#allocation9], %s1193_s25, %s1193_s25, %s1194_s26  }
  0x44   :  { %1183 = dma.done.wait [#allocation3], 256  }
  0x45   :  { %1184 = vsyncadd [#allocation3], 4294967040 }
  0x46   :  { %1185 = dma.done.wait [#allocation6], 2048  }
  0x47   :  { %1186 = vsyncadd [#allocation6], 4294965248 }
  0x48   :  { %1187 = dma.done.wait [#allocation9], 1024  }
  0x49   :  { %1188 = vsyncadd [#allocation9], 4294966272  ;;  %v1197_v0 = vmov 0.0   ;;  %vm1198_vm0 = vmmov 0   ;;  %v1023_v1 = vld [vmem:[#allocation2] sm:$0xff]   ;;  %v1024_v2 = vld [vmem:[#allocation2 + $0x8] sm:$0xff]   ;;  %v167_v36 = vlaneseq }
  0x4a   :  { %906 = vmatprep.subr.bf16.mxu0 %v1197_v0  ;;  %910 = vmatprep.mubr.msk.bf16.mxu0 %vm1198_vm0, %v1197_v0  ;;  %v101_v3 = vld [vmem:[%s1483_s0] sm:$0xff]  ;;  %v1026_v6 = vld [vmem:[%s1485_s2 + $0x8] sm:$0xff]   ;;  %vm123_vm1 = vcmask 261120   ;;  %v1027_v7 = vld [vmem:[%s1485_s2 + $0x10] sm:$0xff]   ;;  %vm785_vm4 = vcmask 130048  }
  0x4b   :  { %914 = vmatprep.subr.bf16.mxu1 %v1197_v0  ;;  %930 = vmatprep.mubr.msk.bf16.mxu1 %vm1198_vm0, %v1197_v0  ;;  %v1025_v4 = vld [vmem:[%s1485_s2] sm:$0xff]   ;;  %v102_v5 = vpack.c.bf16 %v101_v3, %v101_v3  ;;  %v1028_v8 = vld [vmem:[%s1485_s2 + $0x18] sm:$0xff]   ;;  %v1030_v10 = vld [vmem:[%s1485_s2 + $0x28] sm:$0xff]   ;;  %v168_v37 = vand.u32 127, %v167_v36 }
  0x4c   :  { %907 = vmatpush3.bf16.msra.mxu0 %v1023_v1  ;;  %915 = vmatpush3.bf16.msra.mxu1 %v1025_v4  ;;  %v1029_v9 = vld [vmem:[%s1485_s2 + $0x20] sm:$0xff]   ;;  %v1031_v11 = vld [vmem:[%s1485_s2 + $0x30] sm:$0xff]   ;;  %v1032_v12 = vld [vmem:[%s1485_s2 + $0x38] sm:$0xff]  }
  0x4d   :  { %908 = vmatprep.subr.bf16.mxu0 %v1197_v0  ;;  %916 = vmatprep.subr.bf16.mxu1 %v1197_v0  ;;  %v1033_v13 = vld [vmem:[#allocation5] sm:$0xff]   ;;  %v1034_v14 = vld [vmem:[#allocation5 + $0x8] sm:$0xff]   ;;  %v1035_v15 = vld [vmem:[#allocation5 + $0x10] sm:$0xff]   ;;  %vm169_vm2 = vcmp.lt.s32.totalorder %v168_v37, 32 }
  0x4e   :  { %v1036_v16 = vld [vmem:[#allocation5 + $0x18] sm:$0xff]   ;;  %v1037_v17 = vld [vmem:[#allocation5 + $0x20] sm:$0xff]   ;;  %v1038_v18 = vld [vmem:[#allocation5 + $0x28] sm:$0xff]   ;;  %v1396_v43 = vsel %vm169_vm2, 1.0, %v1197_v0 }
  0x4f   :  { %v804_v19 = vld [vmem:[%s1490_s7] ss:$0 sm:$0xff]  ;;  %v1040_v27 = vld [vmem:[#allocation5 + $0x38] sm:$0xff]   ;;  %v818_v38 = vld [vmem:[%s1490_s7 + $0x1] ss:$0 sm:$0xff] }
  0x50   :  { %909 = vmatpush3.bf16.msra.mxu0 %v1024_v2  ;;  %917 = vmatpush3.bf16.msra.mxu1 %v1026_v6  ;;  %v1039_v26 = vld [vmem:[#allocation5 + $0x30] sm:$0xff]   ;;  %v1041_v47 = vld [vmem:[#allocation7] sm:$0xff]   ;;  %v1042_v48 = vld [vmem:[#allocation7 + $0x8] sm:$0xff]  }
  0x51   :  { %934 = vmatprep.subr.bf16.mxu0 %v1197_v0  ;;  %918 = vmatprep.subr.bf16.mxu1 %v1197_v0  ;;  %v809_v28 = vld [vmem:[%s1491_s8] ss:$0 sm:$0xff]  ;;  %v1044_v55 = vld [vmem:[#allocation7 + $0x18] sm:$0xff]   ;;  %v1045_v56 = vld [vmem:[#allocation7 + $0x20] sm:$0xff]  }
  0x52   :  { %v1043_v54 = vld [vmem:[#allocation7 + $0x10] sm:$0xff]   ;;  %v1046_v57 = vld [vmem:[#allocation7 + $0x28] sm:$0xff]   ;;  %v1048_v59 = vld [vmem:[#allocation7 + $0x38] sm:$0xff]  }
  0x53   :  { %911 = vmatmul.mubr.msk.bf16.vlgmr.msra.gmra.mrb[0].mxu0 %vm123_vm1, %v102_v5  ;;  %v1047_v58 = vld [vmem:[#allocation7 + $0x30] sm:$0xff]   ;;  %v1049_v60 = vld [vmem:[#allocation8] sm:$0xff]   ;;  %v1050_v61 = vld [vmem:[#allocation8 + $0x8] sm:$0xff]  }
  0x54   :  { %950 = vmatprep.mubr.msk.bf16.mxu0 %vm1198_vm0, %v1197_v0  ;;  %919 = vmatpush3.bf16.msra.mxu1 %v1027_v7  ;;  %v1051_v62 = vld [vmem:[#allocation8 + $0x10] sm:$0xff]   ;;  %v1052_v63 = vld [vmem:[#allocation8 + $0x18] sm:$0xff]   ;;  %v1053_v1 = vld [vmem:[#allocation8 + $0x20] sm:$0xff]  }
  0x55   :  { %920 = vmatprep.subr.bf16.mxu1 %v1197_v0  ;;  %935 = vmatpush3.bf16.msra.mxu0 %v1033_v13  ;;  %v1054_v2 = vld [vmem:[#allocation8 + $0x28] sm:$0xff]   ;;  %v827_v7 = vld [vmem:[%s1490_s7 + $0x2] ss:$0 sm:$0xff] }
  0x56   :  { %936 = vmatprep.subr.bf16.mxu0 %v1197_v0  ;;  %v1055_v13 = vld [vmem:[#allocation8 + $0x30] sm:$0xff]  }
  0x58   :  { %921 = vmatpush3.bf16.msra.mxu1 %v1028_v8 }
  0x59   :  { %922 = vmatprep.subr.bf16.mxu1 %v1197_v0  ;;  %937 = vmatpush3.bf16.msra.mxu0 %v1034_v14  ;;  %v1056_v14 = vld [vmem:[#allocation8 + $0x38] sm:$0xff]  }
  0x5a   :  { %938 = vmatprep.subr.bf16.mxu0 %v1197_v0 }
  0x5c   :  { %923 = vmatpush3.bf16.msra.mxu1 %v1029_v9  ;;  %v828_v9 = vld [vmem:[%s1490_s7 + $0x3] ss:$0 sm:$0xff] }
  0x5d   :  { %924 = vmatprep.subr.bf16.mxu1 %v1197_v0  ;;  %939 = vmatpush3.bf16.msra.mxu0 %v1035_v15  ;;  %v829_v15 = vld [vmem:[%s1491_s8 + $0x1] ss:$0 sm:$0xff] }
  0x5e   :  { %940 = vmatprep.subr.bf16.mxu0 %v1197_v0 }
  0x60   :  { %925 = vmatpush3.bf16.msra.mxu1 %v1030_v10 }
  0x61   :  { %926 = vmatprep.subr.bf16.mxu1 %v1197_v0  ;;  %941 = vmatpush3.bf16.msra.mxu0 %v1036_v16 }
  0x62   :  { %942 = vmatprep.subr.bf16.mxu0 %v1197_v0 }
  0x64   :  { %927 = vmatpush3.bf16.msra.mxu1 %v1031_v11 }
  0x65   :  { %928 = vmatprep.subr.bf16.mxu1 %v1197_v0  ;;  %943 = vmatpush3.bf16.msra.mxu0 %v1037_v17 }
  0x66   :  { %944 = vmatprep.subr.bf16.mxu0 %v1197_v0 }
  0x68   :  { %929 = vmatpush3.bf16.msra.mxu1 %v1032_v12 }
  0x69   :  { %954 = vmatprep.subr.bf16.mxu1 %v1197_v0  ;;  %945 = vmatpush3.bf16.msra.mxu0 %v1038_v18 }
  0x6a   :  { %946 = vmatprep.subr.bf16.mxu0 %v1197_v0 }
  0x6d   :  { %947 = vmatpush3.bf16.msra.mxu0 %v1039_v26 }
  0x6e   :  { %948 = vmatprep.subr.bf16.mxu0 %v1197_v0 }
  0x71   :  { %949 = vmatpush3.bf16.msra.mxu0 %v1040_v27 }
  0x72   :  { %974 = vmatprep.subr.bf16.mxu0 %v1197_v0 }
 0x126   :  { %v161_v20 = vpop.f32.mrb[0].mxu0 }
 0x127   :  { %v162_v21 = vadd.f32 %v804_v19, %v161_v20  ;;  %v912_v22 = vpop.f32.mrb[1].mxu0 }
 0x128   :  { %v164_v23 = vpop.f32.mrb[2].mxu0 }
 0x129   :  { %v204_v24 = vpack.c.bf16 %v162_v21, %v162_v21  ;;  %v913_v25 = vpop.f32.mrb[3].mxu0  ;;  %v838_v23 = vld [vmem:[%s1490_s7 + $0x4] ss:$0 sm:$0xff] }
 0x12b   :  { %931 = vmatmul.mubr.bf16.vlgmr.msra.gmra.mrb[0].mxu1 %v204_v24 }
 0x12c   :  { %970 = vmatprep.mubr.msk.bf16.mxu1 %vm1198_vm0, %v1197_v0  ;;  %955 = vmatpush3.bf16.msra.mxu1 %v1041_v47 }
 0x12d   :  { %956 = vmatprep.subr.bf16.mxu1 %v1197_v0 }
 0x130   :  { %957 = vmatpush3.bf16.msra.mxu1 %v1042_v48  ;;  %v847_v48 = vld [vmem:[%s1490_s7 + $0x5] ss:$0 sm:$0xff] }
 0x131   :  { %958 = vmatprep.subr.bf16.mxu1 %v1197_v0 }
 0x134   :  { %959 = vmatpush3.bf16.msra.mxu1 %v1043_v54 }
 0x135   :  { %960 = vmatprep.subr.bf16.mxu1 %v1197_v0 }
 0x138   :  { %961 = vmatpush3.bf16.msra.mxu1 %v1044_v55 }
 0x139   :  { %962 = vmatprep.subr.bf16.mxu1 %v1197_v0 }
 0x13c   :  { %963 = vmatpush3.bf16.msra.mxu1 %v1045_v56 }
 0x13d   :  { %964 = vmatprep.subr.bf16.mxu1 %v1197_v0 }
 0x140   :  { %965 = vmatpush3.bf16.msra.mxu1 %v1046_v57 }
 0x141   :  { %966 = vmatprep.subr.bf16.mxu1 %v1197_v0 }
 0x144   :  { %967 = vmatpush3.bf16.msra.mxu1 %v1047_v58 }
 0x145   :  { %968 = vmatprep.subr.bf16.mxu1 %v1197_v0 }
 0x148   :  { %969 = vmatpush3.bf16.msra.mxu1 %v1048_v59 }
 0x149   :  { %994 = vmatprep.subr.bf16.mxu1 %v1197_v0 }
 0x1fe   :  { %v291_v29 = vpop.f32.mrb[0].mxu1 }
 0x1ff   :  { %v292_v30 = vadd.f32 %v809_v28, %v291_v29  ;;  %v932_v31 = vpop.f32.mrb[1].mxu1 }
 0x200   :  { %v294_v32 = vpop.f32.mrb[2].mxu1  ;;  %v1057_v31 = vld [vmem:[%s1489_s6] sm:$0xff]  }
 0x201   :  { %v297_v33 = vmax.f32 %v292_v30, 0.0  ;;  %v933_v34 = vpop.f32.mrb[3].mxu1  ;;  %v1058_v32 = vld [vmem:[%s1489_s6 + $0x8] sm:$0xff]  }
 0x203   :  { %v298_v35 = vpack.c.bf16 %v297_v33, %v297_v33 }
 0x205   :  { %951 = vmatmul.mubr.bf16.vlgmr.msra.gmra.mrb[4].mxu0 %v298_v35 }
 0x206   :  { %990 = vmatprep.mubr.msk.bf16.mxu0 %vm1198_vm0, %v1197_v0  ;;  %975 = vmatpush3.bf16.msra.mxu0 %v1049_v60 }
 0x207   :  { %976 = vmatprep.subr.bf16.mxu0 %v1197_v0 }
 0x20a   :  { %977 = vmatpush3.bf16.msra.mxu0 %v1050_v61 }
 0x20b   :  { %978 = vmatprep.subr.bf16.mxu0 %v1197_v0 }
 0x20e   :  { %979 = vmatpush3.bf16.msra.mxu0 %v1051_v62 }
 0x20f   :  { %980 = vmatprep.subr.bf16.mxu0 %v1197_v0 }
 0x212   :  { %981 = vmatpush3.bf16.msra.mxu0 %v1052_v63 }
 0x213   :  { %982 = vmatprep.subr.bf16.mxu0 %v1197_v0 }
 0x216   :  { %983 = vmatpush3.bf16.msra.mxu0 %v1053_v1 }
 0x217   :  { %984 = vmatprep.subr.bf16.mxu0 %v1197_v0 }
 0x21a   :  { %985 = vmatpush3.bf16.msra.mxu0 %v1054_v2 }
 0x21b   :  { %986 = vmatprep.subr.bf16.mxu0 %v1197_v0 }
 0x21e   :  { %987 = vmatpush3.bf16.msra.mxu0 %v1055_v13 }
 0x21f   :  { %988 = vmatprep.subr.bf16.mxu0 %v1197_v0 }
 0x222   :  { %989 = vmatpush3.bf16.msra.mxu0 %v1056_v14 }
 0x2d8   :  { %v385_v39 = vpop.f32.mrb[4].mxu0 }
 0x2d9   :  { %v386_v40 = vadd.f32 %v818_v38, %v385_v39  ;;  %v952_v41 = vpop.f32.mrb[5].mxu0  ;;  %v1059_v38 = vld [vmem:[%s1489_s6 + $0x10] sm:$0xff]   ;;  %v1060_v39 = vld [vmem:[%s1489_s6 + $0x18] sm:$0xff]  }
 0x2da   :  { %v388_v42 = vpop.f32.mrb[6].mxu0  ;;  %v1062_v41 = vld [vmem:[%s1489_s6 + $0x28] sm:$0xff]  }
 0x2db   :  { %v953_v44 = vpop.f32.mrb[7].mxu0  ;;  %v391_v45 = vadd.f32 %v386_v40, %v162_v21  ;;  %v1061_v40 = vld [vmem:[%s1489_s6 + $0x20] sm:$0xff]   ;;  %v1063_v42 = vld [vmem:[%s1489_s6 + $0x30] sm:$0xff]  }
 0x2dd   :  { %v392_v46 = vmul.f32 %v1396_v43, %v391_v45 }
 0x2df   :  { %393 = vadd.xlane.f32.xlu0 %v392_v46 }
 0x36c   :  { %v394_v49 = vpop.xlane.xlu0 %393 }
 0x36d   :  { %v395_v50 = vmul.f32 0.03125, %v394_v49 }
 0x36f   :  { %v396_v51 = vsub.f32 %v391_v45, %v395_v50  ;;  %v848_v50 = vld [vmem:[%s1490_s7 + $0x6] ss:$0 sm:$0xff]  ;;  %s1199_s7 = smov [#allocation10]  }
 0x371   :  { %v397_v52 = vmul.f32 %v396_v51, %v396_v51 }
 0x373   :  { %v398_v53 = vmul.f32 %v1396_v43, %v397_v52 }
 0x375   :  { %399 = vadd.xlane.f32.xlu0 %v398_v53 }
 0x402   :  { %v400_v3 = vpop.xlane.xlu0 %399 }
 0x403   :  { %v401_v4 = vmul.f32 0.03125, %v400_v3 }
 0x405   :  { %v402_v5 = vadd.f32 1e-05, %v401_v4 }
 0x407   :  { %1065 = vrsqrt.f32 %v402_v5 }
 0x411   :  { %v1066_v6 = vpop.eup %1065 }
 0x412   :  { %v404_v8 = vmul.f32 %v1066_v6, %v396_v51 }
 0x414   :  { %v409_v10 = vmul.f32 %v827_v7, %v404_v8 }
 0x416   :  { %v414_v11 = vadd.f32 %v828_v9, %v409_v10 }
 0x418   :  { %v447_v12 = vpack.c.bf16 %v414_v11, %v414_v11 }
 0x41a   :  { %971 = vmatmul.mubr.bf16.vlgmr.msra.gmra.mrb[4].mxu1 %v447_v12 }
 0x41b   :  { %1010 = vmatprep.mubr.msk.bf16.mxu1 %vm1198_vm0, %v1197_v0  ;;  %995 = vmatpush3.bf16.msra.mxu1 %v1057_v31 }
 0x41c   :  { %996 = vmatprep.subr.bf16.mxu1 %v1197_v0 }
 0x41f   :  { %997 = vmatpush3.bf16.msra.mxu1 %v1058_v32 }
 0x420   :  { %998 = vmatprep.subr.bf16.mxu1 %v1197_v0 }
 0x423   :  { %999 = vmatpush3.bf16.msra.mxu1 %v1059_v38 }
 0x424   :  { %1000 = vmatprep.subr.bf16.mxu1 %v1197_v0 }
 0x427   :  { %1001 = vmatpush3.bf16.msra.mxu1 %v1060_v39 }
 0x428   :  { %1002 = vmatprep.subr.bf16.mxu1 %v1197_v0 }
 0x42b   :  { %1003 = vmatpush3.bf16.msra.mxu1 %v1061_v40 }
 0x42c   :  { %1004 = vmatprep.subr.bf16.mxu1 %v1197_v0 }
 0x42f   :  { %1005 = vmatpush3.bf16.msra.mxu1 %v1062_v41 }
 0x430   :  { %1006 = vmatprep.subr.bf16.mxu1 %v1197_v0 }
 0x433   :  { %1007 = vmatpush3.bf16.msra.mxu1 %v1063_v42 }
 0x434   :  { %1008 = vmatprep.subr.bf16.mxu1 %v1197_v0  ;;  %v849_v0 = vld [vmem:[%s1492_s9] ss:$0 sm:$0xff]  ;;  %s793_s9 = sshll.u32 %s1199_s7, 4  ;;  %s794_s9 = int_to_ptr.vmem [resolvable:$true] %s793_s9 }
 0x435   :  { %s1161_s5 = scalar_lea.vmem %s794_s9, 128  ;;  %p1166_p5 = scmp.lt.s32.totalorder %s794_s9, %s794_s9 }
 0x436   :  { %p1162_p4 = scmp.ne.s32.totalorder %s794_s9, %s1161_s5  ;;  %p1167_p6 = scmp.lt.s32.totalorder %s1161_s5, %s1161_s5 }
 0x438   :  { %p1168_p7 = por %p1167_p6, %p1166_p5 }
 0x43a   :  { %p1169_p8 = pnand %p1168_p7, %p1162_p4 }
 0x4ed   :  { %v534_v16 = vpop.f32.mrb[4].mxu1 }
 0x4ee   :  { %v535_v17 = vadd.f32 %v829_v15, %v534_v16  ;;  %v972_v18 = vpop.f32.mrb[5].mxu1 }
 0x4ef   :  { %v537_v19 = vpop.f32.mrb[6].mxu1 }
 0x4f0   :  { %v540_v20 = vmax.f32 %v535_v17, 0.0  ;;  %v973_v21 = vpop.f32.mrb[7].mxu1 }
 0x4f2   :  { %v541_v22 = vpack.c.bf16 %v540_v20, %v540_v20 }
 0x4f4   :  { %991 = vmatmul.mubr.bf16.vlgmr.msra.gmra.mrb[8].mxu0 %v541_v22 }
 0x5c7   :  { %v628_v24 = vpop.f32.mrb[8].mxu0 }
 0x5c8   :  { %v629_v25 = vadd.f32 %v838_v23, %v628_v24  ;;  %v992_v26 = vpop.f32.mrb[9].mxu0 }
 0x5c9   :  { %v631_v27 = vpop.f32.mrb[10].mxu0 }
 0x5ca   :  { %v993_v28 = vpop.f32.mrb[11].mxu0  ;;  %v634_v29 = vadd.f32 %v629_v25, %v414_v11 }
 0x5cc   :  { %v635_v30 = vmul.f32 %v1396_v43, %v634_v29 }
 0x5ce   :  { %636 = vadd.xlane.f32.xlu1 %v635_v30 }
 0x65b   :  { %v637_v33 = vpop.xlane.xlu1 %636 }
 0x65c   :  { %v638_v34 = vmul.f32 0.03125, %v637_v33 }
 0x65e   :  { %v639_v35 = vsub.f32 %v634_v29, %v638_v34 }
 0x660   :  { %v640_v36 = vmul.f32 %v639_v35, %v639_v35 }
 0x662   :  { %v641_v37 = vmul.f32 %v1396_v43, %v640_v36  ;;  %v1064_v43 = vld [vmem:[%s1489_s6 + $0x38] sm:$0xff]  }
 0x663   :  { %1009 = vmatpush3.bf16.msra.mxu1 %v1064_v43 }
 0x664   :  { %642 = vadd.xlane.f32.xlu1 %v641_v37 }
 0x6f1   :  { %v643_v44 = vpop.xlane.xlu1 %642 }
 0x6f2   :  { %v644_v45 = vmul.f32 0.03125, %v643_v44 }
 0x6f4   :  { %v645_v46 = vadd.f32 1e-05, %v644_v45 }
 0x6f6   :  { %1067 = vrsqrt.f32 %v645_v46 }
 0x700   :  { %v1068_v47 = vpop.eup %1067 }
 0x701   :  { %v647_v49 = vmul.f32 %v1068_v47, %v639_v35 }
 0x703   :  { %v652_v51 = vmul.f32 %v847_v48, %v647_v49 }
 0x705   :  { %v657_v52 = vadd.f32 %v848_v50, %v652_v51 }
 0x707   :  { %v658_v53 = vpack.c.bf16 %v657_v52, %v657_v52 }
 0x709   :  { %1011 = vmatmul.mubr.bf16.vlgmr.msra.gmra.mrb[8].mxu1 %v658_v53 }
 0x7dc   :  { %v764_v54 = vpop.f32.mrb[8].mxu1 }
 0x7dd   :  { %v765_v55 = vadd.f32 %v849_v0, %v764_v54  ;;  %v1012_v56 = vpop.f32.mrb[9].mxu1 }
 0x7de   :  { %v767_v57 = vpop.f32.mrb[10].mxu1 }
 0x7df   :  { %v771_v58 = vand.u32 2147483647, %v765_v55  ;;  %v1013_v59 = vpop.f32.mrb[11].mxu1  ;;  %v770_v7 = vmax.f32 %v765_v55, 0.0 }
 0x7e1   :  { %v772_v60 = vsub.f32 0.0, %v771_v58 }
 0x7e3   :  { %v773_v61 = vmul.f32 1.442695, %v772_v60 }
 0x7e5   :  { %1069 = vpow2.f32 %v773_v61 }
 0x7ef   :  { %v1070_v62 = vpop.eup %1069 }
 0x7f0   :  { %v775_v63 = vadd.f32 1.0, %v1070_v62  ;;  %v778_v1 = vmul.f32 -0.5, %v1070_v62  ;;  %v781_v3 = vand.u32 2147483647, %v1070_v62 }
 0x7f2   :  { %1071 = vlog2.f32 %v775_v63  ;;  %v779_v2 = vadd.f32 1.0, %v778_v1  ;;  %vm782_vm3 = vcmp.lt.f32.partialorder %v781_v3, 0.0004427343 }
 0x7f4   :  { %v780_v6 = vmul.f32 %v1070_v62, %v779_v2 }
 0x7fc   :  { %v1072_v4 = vpop.eup %1071 }
 0x7fd   :  { %v777_v5 = vmul.f32 0.6931472, %v1072_v4 }
 0x7ff   :  { %v783_v8 = vsel %vm782_vm3, %v780_v6, %v777_v5 }
 0x800   :  { %v784_v9 = vadd.f32 %v783_v8, %v770_v7 }
 0x802   :  { %786 = vst.msk [vmem:[#allocation10] sm:$0xff] %vm785_vm4, %v784_v9 }
 0x803   :  { %1172 = shalt.err (!%p1169_p8)
}
 0x804   :  { %s1173_s22 = scalar_lea.hbm %s1493_s10, 128 }
 0x805   :  { %p1174_p9 = scmp.ne.s32.totalorder %s1493_s10, %s1173_s22  ;;  %p1177_p10 = scmp.lt.u32.totalorder %s1173_s22, %s1493_s10 }
 0x807   :  { %p1179_p11 = pnand %p1177_p10, %p1174_p9 }
 0x809   :  { %1182 = shalt.err (!%p1179_p11)
}
 0x80a   :  { %796 = dma.vmem_to_hbm [thread:$0]  %s794_s9, 128, %s1493_s10, [#allocation4]  }
 0x80b   :  { %1189 = dma.done.wait [#allocation4], 128  }
 0x80c   :  { %1190 = vsyncadd [#allocation4], 4294967168 }
 0x80d   :  { %800 = vsyncpa [#allocation3], 1 }
 0x80e   :  { %801 = vsyncpa [#allocation6], 1 }
 0x80f   :  { %802 = vsyncpa [#allocation9], 1 }
 0x810   :  { %803 = vsyncpa [#allocation4], 1 }

</bundles_post_ra>
